<compile_context>
chip_gen: v7x
topology: tpu7x:2x2x1
jax: 0.10.0
libtpu: 0.0.40
codegen_flags: <defaults>
</compile_context>

<pallas_src>
import functools
import math

import numpy as np

import jax
import jax.numpy as jnp
from jax.experimental import pallas as pl
from jax.experimental.pallas import tpu as pltpu

GROUPS = 8
EPS = 1e-5
N_HEADS = 8
OUT_LANE_PAD = 128

_VMEM_LIMIT = None


def _vmem_limit():
    """Generation-aware scoped-VMEM limit (~0.75x physical), 48 MiB fallback."""
    global _VMEM_LIMIT
    if _VMEM_LIMIT is None:
        try:
            _VMEM_LIMIT = int(pltpu.get_tpu_info().vmem_capacity_bytes * 3 // 4)
        except Exception:
            _VMEM_LIMIT = 48 * 1024 * 1024
    return _VMEM_LIMIT


def _grid_params(grid):
    return pltpu.CompilerParams(dimension_semantics=("parallel",) * len(grid),
                                vmem_limit_bytes=_vmem_limit())


def _nogrid_params():
    return pltpu.CompilerParams(vmem_limit_bytes=_vmem_limit())


def _full_spec(a):
    nd = a.ndim
    return pl.BlockSpec(a.shape, lambda *_, _nd=nd: (0,) * _nd)


def _conv_pad_rows(W):
    # enough zero rows above/below the image so every 3x3 tap is a full-height slice
    return ((W + 1 + 15) // 16) * 16


# ----------------------------------------------------------------------------
# trace-time constant tables (numpy), passed into kernels as tiny inputs
# ----------------------------------------------------------------------------
@functools.lru_cache(maxsize=None)
def _gn_onehots(c):
    cg = c // GROUPS
    oh = (np.arange(c)[:, None] // cg == np.arange(GROUPS)[None, :]).astype(np.float32)
    return jnp.asarray(oh), jnp.asarray(np.ascontiguousarray(oh.T))   # (C,G), (G,C)


@functools.lru_cache(maxsize=None)
def _attn_aux(c, s, n_heads):
    hd = c // n_heads
    hs = n_heads * s
    head_of_row = np.arange(hs) // s
    head_mask = (np.arange(c)[None, :] // hd == head_of_row[:, None]).astype(np.float32)
    block_sum = (head_of_row[:, None] == np.arange(n_heads)[None, :]).astype(np.float32)
    return (jnp.asarray(head_mask, dtype=jnp.bfloat16),                # (HS, C)
            jnp.asarray(block_sum),                                    # (HS, H)
            jnp.asarray(np.ascontiguousarray(block_sum.T)))            # (H, HS)


@functools.lru_cache(maxsize=None)
def _edge_masks(H, W):
    x = np.arange(H * W) % W
    m = np.stack([(x != 0), (x != W - 1)], axis=1).astype(np.float32)  # [not_left, not_right]
    return jnp.asarray(m, dtype=jnp.bfloat16)                          # (N, 2)


# ----------------------------------------------------------------------------
# in-kernel helpers
# ----------------------------------------------------------------------------
def _group_norm(h, gamma, beta, cg_mat, gc_mat):
    """GroupNorm(GROUPS) over an (N, C) f32 tile belonging to one batch element."""
    n_pix, c = h.shape
    cnt = float(n_pix * (c // GROUPS))
    s = jnp.sum(h, axis=0, keepdims=True)                 # (1, C)
    sq = jnp.sum(h * h, axis=0, keepdims=True)            # (1, C)
    mean_g = jnp.dot(s, cg_mat, preferred_element_type=jnp.float32) / cnt
    msq_g = jnp.dot(sq, cg_mat, preferred_element_type=jnp.float32) / cnt
    var_g = jnp.maximum(msq_g - mean_g * mean_g, 0.0)
    inv_g = jax.lax.rsqrt(var_g + EPS)
    mean_c = jnp.dot(mean_g, gc_mat, preferred_element_type=jnp.float32)
    inv_c = jnp.dot(inv_g, gc_mat, preferred_element_type=jnp.float32)
    return (h - mean_c) * inv_c * gamma + beta


def _conv3x3_im2col(act, edge, a_ref, im_ref, w_ref, bias, W):
    """3x3 'same' conv for one batch element via a single K=9*Cin matmul.

    act   : (N, Cin) bf16 value (already activated), N = H*W
    edge  : (N, 2) bf16 [not_left, not_right] per-pixel column masks
    a_ref : (N + 2*pad, Cin) bf16 scratch (zero-padded image rows)
    im_ref: (N, 9*Cin) bf16 im2col scratch
    w_ref : (9*Cin, Cout) bf16 weights; bias: (1, Cout) f32.  Returns (N, Cout) f32.
    """
    n_pix, cin = act.shape
    pad = (a_ref.shape[0] - n_pix) // 2
    zeros = jnp.zeros((pad, cin), a_ref.dtype)
    a_ref[0:pad, :] = zeros
    a_ref[pad:pad + n_pix, :] = act
    a_ref[pad + n_pix:pad + n_pix + pad, :] = zeros

    not_left = edge[:, 0:1]
    not_right = edge[:, 1:2]
    for k in range(9):
        dy, dx = k // 3 - 1, k % 3 - 1
        s = dy * W + dx
        src = a_ref[pad + s:pad + s + n_pix, :]            # full-height shifted slice
        if dx == -1:
            src = src * not_left
        elif dx == 1:
            src = src * not_right
        im_ref[:, k * cin:(k + 1) * cin] = src             # sublane-aligned full store
    out = jnp.dot(im_ref[...], w_ref[...], preferred_element_type=jnp.float32)
    return out + bias


# ----------------------------------------------------------------------------
# kernels
# ----------------------------------------------------------------------------
def _make_resblock_kernel(H, W, use_res_conv):
    def body(x_ref, film_ref, em_ref, cg_ref, gc_ref,
             w1_ref, b1_ref, g1_ref, be1_ref,
             w2_ref, b2_ref, g2_ref, be2_ref,
             wr_ref, br_ref, out_ref,
             a1_ref, im1_ref, a2_ref, im2_ref):
        c_out = out_ref.shape[2]
        x = x_ref[0]                                        # (N, Cin) bf16
        edge = em_ref[...]
        film = film_ref[0]                                  # (1, 2*Cout) f32
        scale = film[:, :c_out]
        shift = film[:, c_out:]

        # stage 1: conv3x3(silu(x)) -> GroupNorm -> FiLM
        h = _conv3x3_im2col(jax.nn.silu(x), edge, a1_ref, im1_ref,
                            w1_ref, b1_ref[...], W)
        h = _group_norm(h, g1_ref[...], be1_ref[...], cg_ref[...], gc_ref[...])
        h = h * (scale + 1.0) + shift

        # stage 2: conv3x3(silu(h)) -> GroupNorm
        h2 = _conv3x3_im2col(jax.nn.silu(h.astype(jnp.bfloat16)), edge, a2_ref,
                             im2_ref, w2_ref, b2_ref[...], W)
        h2 = _group_norm(h2, g2_ref[...], be2_ref[...], cg_ref[...], gc_ref[...])

        # residual path (1x1 conv or identity)
        if use_res_conv:
            res = jnp.dot(x, wr_ref[...], preferred_element_type=jnp.float32) + br_ref[...]
        else:
            res = x.astype(jnp.float32)
        out_ref[0] = (h2 + res).astype(out_ref.dtype)

    if use_res_conv:
        return body

    def kernel(x_ref, film_ref, em_ref, cg_ref, gc_ref,
               w1_ref, b1_ref, g1_ref, be1_ref,
               w2_ref, b2_ref, g2_ref, be2_ref,
               out_ref, a1_ref, im1_ref, a2_ref, im2_ref):
        return body(x_ref, film_ref, em_ref, cg_ref, gc_ref,
                    w1_ref, b1_ref, g1_ref, be1_ref,
                    w2_ref, b2_ref, g2_ref, be2_ref,
                    None, None, out_ref, a1_ref, im1_ref, a2_ref, im2_ref)
    return kernel


def _make_attn_kernel(n_heads):
    def kernel(x_ref, ctx_ref, hm_ref, bs_ref, bse_ref,
               wq_ref, wk_ref, wv_ref, wo_ref, bo_ref, out_ref):
        x = x_ref[0]                                        # (N, C) bf16
        ctx = ctx_ref[0]                                    # (S, Dc) bf16
        c = x.shape[1]
        inv_scale = 1.0 / math.sqrt(c // n_heads)

        q = jnp.dot(x, wq_ref[...], preferred_element_type=jnp.float32)
        k = jnp.dot(ctx, wk_ref[...], preferred_element_type=jnp.float32)
        v = jnp.dot(ctx, wv_ref[...], preferred_element_type=jnp.float32)

        # Block-diagonal trick: replicate K/V per head and zero other heads' channels
        # so all heads are handled by two full-K lane-dense matmuls (no head loop).
        hm = hm_ref[...]                                    # (H*S, C) bf16 {0,1}
        k_stack = jnp.concatenate([k.astype(jnp.bfloat16)] * n_heads, axis=0) * hm
        v_stack = jnp.concatenate([v.astype(jnp.bfloat16)] * n_heads, axis=0) * hm

        scores = jax.lax.dot_general(
            q.astype(jnp.bfloat16), k_stack, (((1,), (1,)), ((), ())),
            preferred_element_type=jnp.float32) * inv_scale            # (N, H*S)

        m = jnp.max(scores, axis=-1, keepdims=True)                    # global row max
        e = jnp.exp(scores - m)
        denom = jnp.dot(e, bs_ref[...], preferred_element_type=jnp.float32)   # (N, H)
        inv = pl.reciprocal(denom, approx=True)
        inv_full = jnp.dot(inv, bse_ref[...], preferred_element_type=jnp.float32)
        probs = (e * inv_full).astype(jnp.bfloat16)                    # (N, H*S)

        attn = jnp.dot(probs, v_stack, preferred_element_type=jnp.float32)    # (N, C)
        o = jnp.dot(attn.astype(jnp.bfloat16), wo_ref[...],
                    preferred_element_type=jnp.float32) + bo_ref[...]
        out_ref[0] = (x.astype(jnp.float32) + o).astype(out_ref.dtype)
    return kernel


def _make_conv3x3_kernel(H, W, gn_silu):
    if gn_silu:
        def kernel(x_ref, em_ref, cg_ref, gc_ref, g_ref, be_ref, w_ref, b_ref,
                   out_ref, a_ref, im_ref):
            h = _group_norm(x_ref[0].astype(jnp.float32), g_ref[...], be_ref[...],
                            cg_ref[...], gc_ref[...])
            act = jax.nn.silu(h.astype(jnp.bfloat16))
            out_ref[0] = _conv3x3_im2col(act, em_ref[...], a_ref, im_ref, w_ref,
                                         b_ref[...], W).astype(out_ref.dtype)
        return kernel

    def kernel(x_ref, em_ref, w_ref, b_ref, out_ref, a_ref, im_ref):
        out_ref[0] = _conv3x3_im2col(x_ref[0], em_ref[...], a_ref, im_ref, w_ref,
                                     b_ref[...], W).astype(out_ref.dtype)
    return kernel


def _downsample_kernel(x_ref, w_ref, b_ref, out_ref):
    out_ref[0] = (jnp.dot(x_ref[0], w_ref[...],
                          preferred_element_type=jnp.float32)
                  + b_ref[...]).astype(out_ref.dtype)


def _film_kernel(t_ref, wm_ref, bm_ref, out_ref):
    h = jax.nn.silu(t_ref[...])
    out_ref[...] = jnp.dot(h.astype(jnp.bfloat16), wm_ref[...],
                           preferred_element_type=jnp.float32) + bm_ref[...]


def _time_mlp_kernel(e_ref, w1_ref, b1_ref, w2_ref, b2_ref, out_ref):
    h = jnp.dot(e_ref[...].astype(jnp.bfloat16), w1_ref[...],
                preferred_element_type=jnp.float32) + b1_ref[...]
    h = jax.nn.silu(h)
    out_ref[...] = jnp.dot(h.astype(jnp.bfloat16), w2_ref[...],
                           preferred_element_type=jnp.float32) + b2_ref[...]


# ----------------------------------------------------------------------------
# pallas_call wrappers
# ----------------------------------------------------------------------------
def resblock_apply(p, x, film, H, W):
    B, N, Cin = x.shape
    C = p["b1"].shape[1]
    use_res_conv = not p["identity"]
    pad = _conv_pad_rows(W)
    cg_mat, gc_mat = _gn_onehots(C)
    em = _edge_masks(H, W)
    film3 = film.reshape(B, 1, 2 * C)
    kernel = _make_resblock_kernel(H, W, use_res_conv)
    args = [x, film3, em, cg_mat, gc_mat,
            p["w1"], p["b1"], p["g1"], p["be1"],
            p["w2"], p["b2"], p["g2"], p["be2"]]
    if use_res_conv:
        args += [p["wr"], p["br"]]
    in_specs = [pl.BlockSpec((1, N, Cin), lambda b: (b, 0, 0)),
                pl.BlockSpec((1, 1, 2 * C), lambda b: (b, 0, 0))]
    in_specs += [_full_spec(a) for a in args[2:]]
    return pl.pallas_call(
        kernel,
        grid=(B,),
        out_shape=jax.ShapeDtypeStruct((B, N, C), jnp.bfloat16),
        in_specs=in_specs,
        out_specs=pl.BlockSpec((1, N, C), lambda b: (b, 0, 0)),
        scratch_shapes=[
            pltpu.VMEM((N + 2 * pad, Cin), jnp.bfloat16),
            pltpu.VMEM((N, 9 * Cin), jnp.bfloat16),
            pltpu.VMEM((N + 2 * pad, C), jnp.bfloat16),
            pltpu.VMEM((N, 9 * C), jnp.bfloat16),
        ],
        compiler_params=_grid_params((B,)),
    )(*args)


def attn_apply(p, x, context):
    B, N, C = x.shape
    S, Dc = context.shape[1], context.shape[2]
    hm, bs, bse = _attn_aux(C, S, N_HEADS)
    kernel = _make_attn_kernel(N_HEADS)
    args = (x, context, hm, bs, bse, p["wq"], p["wk"], p["wv"], p["wo"], p["bo"])
    in_specs = [pl.BlockSpec((1, N, C), lambda b: (b, 0, 0)),
                pl.BlockSpec((1, S, Dc), lambda b: (b, 0, 0))]
    in_specs += [_full_spec(a) for a in args[2:]]
    return pl.pallas_call(
        kernel,
        grid=(B,),
        out_shape=jax.ShapeDtypeStruct((B, N, C), jnp.bfloat16),
        in_specs=in_specs,
        out_specs=pl.BlockSpec((1, N, C), lambda b: (b, 0, 0)),
        compiler_params=_grid_params((B,)),
    )(*args)


def conv3x3_apply(p, x, H, W, gn_silu=False, out_dtype=jnp.bfloat16):
    B, N, Cin = x.shape
    Cout = p["w"].shape[1]
    pad = _conv_pad_rows(W)
    em = _edge_masks(H, W)
    kernel = _make_conv3x3_kernel(H, W, gn_silu)
    if gn_silu:
        cg_mat, gc_mat = _gn_onehots(Cin)
        args = (x, em, cg_mat, gc_mat, p["g"], p["be"], p["w"], p["b"])
    else:
        args = (x, em, p["w"], p["b"])
    in_specs = [pl.BlockSpec((1, N, Cin), lambda b: (b, 0, 0))]
    in_specs += [_full_spec(a) for a in args[1:]]
    return pl.pallas_call(
        kernel,
        grid=(B,),
        out_shape=jax.ShapeDtypeStruct((B, N, Cout), out_dtype),
        in_specs=in_specs,
        out_specs=pl.BlockSpec((1, N, Cout), lambda b: (b, 0, 0)),
        scratch_shapes=[pltpu.VMEM((N + 2 * pad, Cin), jnp.bfloat16),
                        pltpu.VMEM((N, 9 * Cin), jnp.bfloat16)],
        compiler_params=_grid_params((B,)),
    )(*args)


def downsample_apply(p, x, H, W):
    # TODO(synk): the stride-2 4x4 patch extraction (pure gather) stays wrapper-side;
    # the matmul runs in Pallas, gridded over batch, on bf16 patches.
    B, N, C = x.shape
    Ho, Wo = H // 2, W // 2
    No = Ho * Wo
    patches = _extract_patches_4x4_s2(x.reshape(B, H, W, C))          # (B, No, 16*C)
    return pl.pallas_call(
        _downsample_kernel,
        grid=(B,),
        out_shape=jax.ShapeDtypeStruct((B, No, C), jnp.bfloat16),
        in_specs=[pl.BlockSpec((1, No, 16 * C), lambda b: (b, 0, 0)),
                  _full_spec(p["w"]), _full_spec(p["b"])],
        out_specs=pl.BlockSpec((1, No, C), lambda b: (b, 0, 0)),
        compiler_params=_grid_params((B,)),
    )(patches, p["w"], p["b"])


def film_apply(p, t):
    B = t.shape[0]
    C2 = p["bm"].shape[1]
    return pl.pallas_call(
        _film_kernel,
        out_shape=jax.ShapeDtypeStruct((B, C2), jnp.float32),
        in_specs=[pl.BlockSpec(memory_space=pltpu.MemorySpace.VMEM)] * 3,
        out_specs=pl.BlockSpec(memory_space=pltpu.MemorySpace.VMEM),
        compiler_params=_nogrid_params(),
    )(t, p["wm"], p["bm"])


def time_mlp_apply(p, time):
    emb = _sinusoidal_embedding(time, p["w1"].shape[0])
    B, D = emb.shape
    return pl.pallas_call(
        _time_mlp_kernel,
        out_shape=jax.ShapeDtypeStruct((B, D), jnp.float32),
        in_specs=[pl.BlockSpec(memory_space=pltpu.MemorySpace.VMEM)] * 5,
        out_specs=pl.BlockSpec(memory_space=pltpu.MemorySpace.VMEM),
        compiler_params=_nogrid_params(),
    )(emb, p["w1"], p["b1"], p["w2"], p["b2"])


# ----------------------------------------------------------------------------
# wrapper-side data movement (shared by the Pallas path and the reference)
# ----------------------------------------------------------------------------
def _sinusoidal_embedding(time, dim):
    half = dim // 2
    freqs = jnp.exp(jnp.arange(half, dtype=jnp.float32) *
                    (-math.log(10000.0) / (half - 1)))
    args = time.astype(jnp.float32)[:, None] * freqs[None, :]
    return jnp.concatenate([jnp.sin(args), jnp.cos(args)], axis=-1)


def _pad_channels(x_bnc, multiple):
    c = x_bnc.shape[-1]
    if c % multiple == 0:
        return x_bnc
    padc = multiple - c % multiple
    zeros = jnp.zeros(x_bnc.shape[:-1] + (padc,), x_bnc.dtype)
    return jnp.concatenate([x_bnc, zeros], axis=-1)


def _extract_patches_4x4_s2(x_nhwc):
    B, H, W, C = x_nhwc.shape
    Ho, Wo = H // 2, W // 2
    xp = jnp.pad(x_nhwc, ((0, 0), (1, 1), (1, 1), (0, 0)))
    cols = []
    for ky in range(4):
        for kx in range(4):
            cols.append(xp[:, ky:ky + H:2, kx:kx + W:2, :])
    return jnp.concatenate(cols, axis=-1).reshape(B, Ho * Wo, 16 * C)


def _upsample2x_bilinear(x_nhwc):
    # TODO(synk): bilinear 2x upsample (align_corners=False) kept in the JAX wrapper.
    def up(a, axis):
        n = a.shape[axis]
        idx = jnp.arange(n)
        prev = jnp.take(a, jnp.clip(idx - 1, 0, n - 1), axis=axis)
        nxt = jnp.take(a, jnp.clip(idx + 1, 0, n - 1), axis=axis)
        even = 0.25 * prev + 0.75 * a
        odd = 0.75 * a + 0.25 * nxt
        out = jnp.stack([even, odd], axis=axis + 1)
        shp = list(a.shape)
        shp[axis] = 2 * n
        return out.reshape(shp)
    return up(up(x_nhwc, 1), 2)


def _maybe_upsample(u_bnc, Hs, Ws, Ht, Wt):
    if (Hs, Ws) == (Ht, Wt):
        return u_bnc        # F.interpolate to identical size is the identity
    assert Ht == 2 * Hs and Wt == 2 * Ws
    B = u_bnc.shape[0]
    return _upsample2x_bilinear(u_bnc.reshape(B, Hs, Ws, -1)).reshape(B, Ht * Wt, -1)


# ----------------------------------------------------------------------------
# parameters
# ----------------------------------------------------------------------------
def _rnorm(key, shape, std):
    return jax.random.normal(key, shape, jnp.float32) * std


def make_conv3x3_params(key, cin, cout):
    k1, k2 = jax.random.split(key)
    return {"w": _rnorm(k1, (9 * cin, cout), 1.0 / math.sqrt(9 * cin)).astype(jnp.bfloat16),
            "b": _rnorm(k2, (1, cout), 0.02)}


def make_linear_params(key, kdim, cout):
    k1, k2 = jax.random.split(key)
    return {"w": _rnorm(k1, (kdim, cout), 1.0 / math.sqrt(kdim)).astype(jnp.bfloat16),
            "b": _rnorm(k2, (1, cout), 0.02)}


def make_resblock_params(key, cin, cout, tdim):
    ks = jax.random.split(key, 12)
    p = {
        "wm": _rnorm(ks[0], (tdim, 2 * cout), 1.0 / math.sqrt(tdim)).astype(jnp.bfloat16),
        "bm": _rnorm(ks[1], (1, 2 * cout), 0.02),
        "w1": _rnorm(ks[2], (9 * cin, cout), 1.0 / math.sqrt(9 * cin)).astype(jnp.bfloat16),
        "b1": _rnorm(ks[3], (1, cout), 0.02),
        "g1": 1.0 + _rnorm(ks[4], (1, cout), 0.05),
        "be1": _rnorm(ks[5], (1, cout), 0.05),
        "w2": _rnorm(ks[6], (9 * cout, cout), 1.0 / math.sqrt(9 * cout)).astype(jnp.bfloat16),
        "b2": _rnorm(ks[7], (1, cout), 0.02),
        "g2": 1.0 + _rnorm(ks[8], (1, cout), 0.05),
        "be2": _rnorm(ks[9], (1, cout), 0.05),
        "identity": cin == cout,
    }
    if cin != cout:
        p["wr"] = _rnorm(ks[10], (cin, cout), 1.0 / math.sqrt(cin)).astype(jnp.bfloat16)
        p["br"] = _rnorm(ks[11], (1, cout), 0.02)
    return p


def make_attn_params(key, c, ctx_dim):
    ks = jax.random.split(key, 5)
    return {
        "wq": _rnorm(ks[0], (c, c), 1.0 / math.sqrt(c)).astype(jnp.bfloat16),
        "wk": _rnorm(ks[1], (ctx_dim, c), 1.0 / math.sqrt(ctx_dim)).astype(jnp.bfloat16),
        "wv": _rnorm(ks[2], (ctx_dim, c), 1.0 / math.sqrt(ctx_dim)).astype(jnp.bfloat16),
        "wo": _rnorm(ks[3], (c, c), 1.0 / math.sqrt(c)).astype(jnp.bfloat16),
        "bo": _rnorm(ks[4], (1, c), 0.02),
    }


def make_time_params(key, tdim):
    ks = jax.random.split(key, 4)
    return {
        "w1": _rnorm(ks[0], (tdim, 4 * tdim), 1.0 / math.sqrt(tdim)).astype(jnp.bfloat16),
        "b1": _rnorm(ks[1], (1, 4 * tdim), 0.02),
        "w2": _rnorm(ks[2], (4 * tdim, tdim), 1.0 / math.sqrt(4 * tdim)).astype(jnp.bfloat16),
        "b2": _rnorm(ks[3], (1, tdim), 0.02),
    }


def make_out_head_params(key, out_ch):
    ks = jax.random.split(key, 4)
    cpad = max(out_ch, OUT_LANE_PAD)
    w = _rnorm(ks[2], (9 * 64, out_ch), 1.0 / math.sqrt(9 * 64))
    b = _rnorm(ks[3], (1, out_ch), 0.02)
    # pad the narrow output head to a lane-dense 128-column conv; wrapper slices it back
    w = jnp.concatenate([w, jnp.zeros((9 * 64, cpad - out_ch), jnp.float32)], axis=1)
    b = jnp.concatenate([b, jnp.zeros((1, cpad - out_ch), jnp.float32)], axis=1)
    return {"g": 1.0 + _rnorm(ks[0], (1, 64), 0.05),
            "be": _rnorm(ks[1], (1, 64), 0.05),
            "w": w.astype(jnp.bfloat16),
            "b": b,
            "out_ch": out_ch}


def init_unet_params(key, in_ch, out_ch, tdim, ctx_dim):
    ks = jax.random.split(key, 20)
    cin_pad = ((in_ch + 7) // 8) * 8
    return {
        "time": make_time_params(ks[0], tdim),
        "init": make_conv3x3_params(ks[1], cin_pad, 64),
        "down1_res": make_resblock_params(ks[2], 64, 128, tdim),
        "down1_attn": make_attn_params(ks[3], 128, ctx_dim),
        "down1_ds": make_linear_params(ks[4], 16 * 128, 128),
        "down2_res": make_resblock_params(ks[5], 128, 256, tdim),
        "down2_attn": make_attn_params(ks[6], 256, ctx_dim),
        "down2_ds": make_linear_params(ks[7], 16 * 256, 256),
        "bot_res1": make_resblock_params(ks[8], 256, 512, tdim),
        "bot_attn": make_attn_params(ks[9], 512, ctx_dim),
        "bot_res2": make_resblock_params(ks[10], 512, 512, tdim),
        "up1_res": make_resblock_params(ks[11], 512 + 256, 256, tdim),
        "up1_attn": make_attn_params(ks[12], 256, ctx_dim),
        "up2_res": make_resblock_params(ks[13], 256 + 128, 128, tdim),
        "up2_attn": make_attn_params(ks[14], 128, ctx_dim),
        "up3_res": make_resblock_params(ks[15], 128 + 64, 64, tdim),
        "up3_attn": make_attn_params(ks[16], 64, ctx_dim),
        "out": make_out_head_params(ks[17], out_ch),
    }


# ----------------------------------------------------------------------------
# full forward pass (Pallas path)
# ----------------------------------------------------------------------------
def unet_forward_pallas(params, x_nchw, time, context):
    B, _, H0, W0 = x_nchw.shape
    x = jnp.transpose(x_nchw, (0, 2, 3, 1)).reshape(B, H0 * W0, -1)
    x = _pad_channels(x.astype(jnp.float32), 8).astype(jnp.bfloat16)
    ctx = context.astype(jnp.bfloat16)

    t = time_mlp_apply(params["time"], time)                           # (B, T) f32

    s1 = conv3x3_apply(params["init"], x, H0, W0)                      # (B, N0, 64)

    h = resblock_apply(params["down1_res"], s1,
                       film_apply(params["down1_res"], t), H0, W0)     # 128
    h = attn_apply(params["down1_attn"], h, ctx)
    s2 = downsample_apply(params["down1_ds"], h, H0, W0)               # (B, N1, 128)
    H1, W1 = H0 // 2, W0 // 2

    h = resblock_apply(params["down2_res"], s2,
                       film_apply(params["down2_res"], t), H1, W1)     # 256
    h = attn_apply(params["down2_attn"], h, ctx)
    s3 = downsample_apply(params["down2_ds"], h, H1, W1)               # (B, N2, 256)
    H2, W2 = H1 // 2, W1 // 2

    b = resblock_apply(params["bot_res1"], s3,
                       film_apply(params["bot_res1"], t), H2, W2)      # 512
    b = attn_apply(params["bot_attn"], b, ctx)
    b = resblock_apply(params["bot_res2"], b,
                       film_apply(params["bot_res2"], t), H2, W2)      # 512

    u = jnp.concatenate([s3, _maybe_upsample(b, H2, W2, H2, W2)], axis=-1)
    u = resblock_apply(params["up1_res"], u,
                       film_apply(params["up1_res"], t), H2, W2)       # 256
    u = attn_apply(params["up1_attn"], u, ctx)

    u = jnp.concatenate([s2, _maybe_upsample(u, H2, W2, H1, W1)], axis=-1)
    u = resblock_apply(params["up2_res"], u,
                       film_apply(params["up2_res"], t), H1, W1)       # 128
    u = attn_apply(params["up2_attn"], u, ctx)

    u = jnp.concatenate([s1, _maybe_upsample(u, H1, W1, H0, W0)], axis=-1)
    u = resblock_apply(params["up3_res"], u,
                       film_apply(params["up3_res"], t), H0, W0)       # 64
    u = attn_apply(params["up3_attn"], u, ctx)

    y = conv3x3_apply(params["out"], u, H0, W0, gn_silu=True,
                      out_dtype=jnp.float32)                           # (B, N0, 128)
    out_ch = params["out"]["out_ch"]
    y = y[:, :, :out_ch]
    return jnp.transpose(y.reshape(B, H0, W0, out_ch), (0, 3, 1, 2))


# ----------------------------------------------------------------------------
# pure-JAX reference (mirrors the kernel math, incl. bf16 boundaries/operands)
# ----------------------------------------------------------------------------
def _ref_conv3x3(x_bnc, w, b, H, W):
    B, N, Cin = x_bnc.shape
    x4 = x_bnc.astype(jnp.bfloat16).reshape(B, H, W, Cin)
    xp = jnp.pad(x4, ((0, 0), (1, 1), (1, 1), (0, 0)))
    cols = [xp[:, ky:ky + H, kx:kx + W, :] for ky in range(3) for kx in range(3)]
    patches = jnp.concatenate(cols, axis=-1).reshape(B, N, 9 * Cin)
    y = jnp.einsum("bnk,kc->bnc", patches, w, preferred_element_type=jnp.float32)
    return y + b.reshape(1, 1, -1)


def _ref_group_norm(h_bnc, gamma, beta):
    B, N, C = h_bnc.shape
    cg = C // GROUPS
    hg = h_bnc.reshape(B, N, GROUPS, cg)
    mean = jnp.mean(hg, axis=(1, 3), keepdims=True)
    msq = jnp.mean(hg * hg, axis=(1, 3), keepdims=True)
    var = jnp.maximum(msq - mean * mean, 0.0)
    inv = jax.lax.rsqrt(var + EPS)
    hn = ((hg - mean) * inv).reshape(B, N, C)
    return hn * gamma.reshape(1, 1, C) + beta.reshape(1, 1, C)


def _ref_film(p, t):
    h = jax.nn.silu(t)
    return jnp.dot(h.astype(jnp.bfloat16), p["wm"],
                   preferred_element_type=jnp.float32) + p["bm"]


def _ref_resblock(p, x_bnc, film, H, W):
    C = p["b1"].shape[1]
    scale = film[:, None, :C]
    shift = film[:, None, C:]
    h = _ref_conv3x3(jax.nn.silu(x_bnc), p["w1"], p["b1"], H, W)
    h = _ref_group_norm(h, p["g1"], p["be1"])
    h = h * (scale + 1.0) + shift
    h = _ref_conv3x3(jax.nn.silu(h.astype(jnp.bfloat16)), p["w2"], p["b2"], H, W)
    h = _ref_group_norm(h, p["g2"], p["be2"])
    if p["identity"]:
        res = x_bnc.astype(jnp.float32)
    else:
        res = jnp.einsum("bnc,cd->bnd", x_bnc, p["wr"],
                         preferred_element_type=jnp.float32) + p["br"].reshape(1, 1, -1)
    return (h + res).astype(jnp.bfloat16)


def _ref_attn(p, x_bnc, ctx):
    B, N, C = x_bnc.shape
    hd = C // N_HEADS
    q = jnp.einsum("bnc,cd->bnd", x_bnc, p["wq"], preferred_element_type=jnp.float32)
    k = jnp.einsum("bsc,cd->bsd", ctx, p["wk"], preferred_element_type=jnp.float32)
    v = jnp.einsum("bsc,cd->bsd", ctx, p["wv"], preferred_element_type=jnp.float32)
    qh = q.astype(jnp.bfloat16).reshape(B, N, N_HEADS, hd)
    kh = k.astype(jnp.bfloat16).reshape(B, -1, N_HEADS, hd)
    vh = v.astype(jnp.bfloat16).reshape(B, -1, N_HEADS, hd)
    scores = jnp.einsum("bnhd,bshd->bhns", qh, kh,
                        preferred_element_type=jnp.float32) * (1.0 / math.sqrt(hd))
    probs = jax.nn.softmax(scores, axis=-1)
    o = jnp.einsum("bhns,bshd->bnhd", probs.astype(jnp.bfloat16), vh,
                   preferred_element_type=jnp.float32).reshape(B, N, C)
    o = jnp.einsum("bnc,cd->bnd", o.astype(jnp.bfloat16), p["wo"],
                   preferred_element_type=jnp.float32) + p["bo"].reshape(1, 1, -1)
    return (x_bnc.astype(jnp.float32) + o).astype(jnp.bfloat16)


def _ref_downsample(p, x_bnc, H, W):
    B, N, C = x_bnc.shape
    patches = _extract_patches_4x4_s2(x_bnc.reshape(B, H, W, C))
    y = jnp.einsum("bnk,kc->bnc", patches, p["w"],
                   preferred_element_type=jnp.float32) + p["b"].reshape(1, 1, -1)
    return y.astype(jnp.bfloat16)


def _ref_time_mlp(p, time):
    emb = _sinusoidal_embedding(time, p["w1"].shape[0])
    h = jnp.dot(emb.astype(jnp.bfloat16), p["w1"],
                preferred_element_type=jnp.float32) + p["b1"]
    h = jax.nn.silu(h)
    return jnp.dot(h.astype(jnp.bfloat16), p["w2"],
                   preferred_element_type=jnp.float32) + p["b2"]


def unet_forward_reference(params, x_nchw, time, context):
    B, _, H0, W0 = x_nchw.shape
    x = jnp.transpose(x_nchw, (0, 2, 3, 1)).reshape(B, H0 * W0, -1)
    x = _pad_channels(x.astype(jnp.float32), 8).astype(jnp.bfloat16)
    ctx = context.astype(jnp.bfloat16)

    t = _ref_time_mlp(params["time"], time)
    s1 = _ref_conv3x3(x, params["init"]["w"], params["init"]["b"],
                      H0, W0).astype(jnp.bfloat16)

    h = _ref_resblock(params["down1_res"], s1, _ref_film(params["down1_res"], t), H0, W0)
    h = _ref_attn(params["down1_attn"], h, ctx)
    s2 = _ref_downsample(params["down1_ds"], h, H0, W0)
    H1, W1 = H0 // 2, W0 // 2

    h = _ref_resblock(params["down2_res"], s2, _ref_film(params["down2_res"], t), H1, W1)
    h = _ref_attn(params["down2_attn"], h, ctx)
    s3 = _ref_downsample(params["down2_ds"], h, H1, W1)
    H2, W2 = H1 // 2, W1 // 2

    b = _ref_resblock(params["bot_res1"], s3, _ref_film(params["bot_res1"], t), H2, W2)
    b = _ref_attn(params["bot_attn"], b, ctx)
    b = _ref_resblock(params["bot_res2"], b, _ref_film(params["bot_res2"], t), H2, W2)

    u = jnp.concatenate([s3, _maybe_upsample(b, H2, W2, H2, W2)], axis=-1)
    u = _ref_resblock(params["up1_res"], u, _ref_film(params["up1_res"], t), H2, W2)
    u = _ref_attn(params["up1_attn"], u, ctx)

    u = jnp.concatenate([s2, _maybe_upsample(u, H2, W2, H1, W1)], axis=-1)
    u = _ref_resblock(params["up2_res"], u, _ref_film(params["up2_res"], t), H1, W1)
    u = _ref_attn(params["up2_attn"], u, ctx)

    u = jnp.concatenate([s1, _maybe_upsample(u, H1, W1, H0, W0)], axis=-1)
    u = _ref_resblock(params["up3_res"], u, _ref_film(params["up3_res"], t), H0, W0)
    u = _ref_attn(params["up3_attn"], u, ctx)

    po = params["out"]
    hh = _ref_group_norm(u.astype(jnp.float32), po["g"], po["be"])
    hh = jax.nn.silu(hh.astype(jnp.bfloat16))
    y = _ref_conv3x3(hh, po["w"], po["b"], H0, W0)
    out_ch = po["out_ch"]
    y = y[:, :, :out_ch]
    return jnp.transpose(y.reshape(B, H0, W0, out_ch), (0, 3, 1, 2))


# ----------------------------------------------------------------------------
# main
# ----------------------------------------------------------------------------
if __name__ == "__main__":
    B, IN_CH, OUT_CH, H, W = 2, 4, 4, 16, 16
    TIME_DIM, CTX_DIM, CTX_LEN = 32, 64, 8

    root = jax.random.PRNGKey(0)
    kp, kx, kt, kc = jax.random.split(root, 4)
    params = init_unet_params(kp, IN_CH, OUT_CH, TIME_DIM, CTX_DIM)
    x = jax.random.normal(kx, (B, IN_CH, H, W), jnp.float32)
    time = jax.random.uniform(kt, (B,), jnp.float32, 0.0, 1000.0)
    context = jax.random.normal(kc, (B, CTX_LEN, CTX_DIM), jnp.float32)

    out = jax.block_until_ready(unet_forward_pallas(params, x, time, context))
    ref = jax.block_until_ready(unet_forward_reference(params, x, time, context))

    assert out.shape == (B, OUT_CH, H, W), out.shape
    assert bool(jnp.isfinite(out).all())
    err = float(jnp.max(jnp.abs(out - ref)))
    assert err < 5e-2, f"max abs err vs reference: {err}"
    print("KERNEL_OK")
</pallas_src>

<mosaic_0001>
module attributes {stable_mosaic.version = 11 : i64} {
  func.func @_time_mlp_kernel(%arg0: memref<2x32xf32, #tpu.memory_space<vmem>>, %arg1: memref<32x128xbf16, #tpu.memory_space<vmem>>, %arg2: memref<1x128xf32, #tpu.memory_space<vmem>>, %arg3: memref<128x32xbf16, #tpu.memory_space<vmem>>, %arg4: memref<1x32xf32, #tpu.memory_space<vmem>>, %arg5: memref<2x32xf32, #tpu.memory_space<vmem>>) attributes {dimension_semantics = [], scalar_prefetch = 0 : i64, scratch_operands = 0 : i64, tpu.core_type = #tpu.core_type<tc>} {
    %c0 = arith.constant 0 : index
    %c0_0 = arith.constant 0 : index
    %0 = vector.load %arg0[%c0, %c0_0] : memref<2x32xf32, #tpu.memory_space<vmem>>, vector<2x32xf32>
    %1 = arith.truncf %0 : vector<2x32xf32> to vector<2x32xbf16>
    %c0_1 = arith.constant 0 : index
    %c0_2 = arith.constant 0 : index
    %2 = vector.load %arg1[%c0_1, %c0_2] : memref<32x128xbf16, #tpu.memory_space<vmem>>, vector<32x128xbf16>
    %cst = arith.constant dense<0.000000e+00> : vector<2x128xf32>
    %3 = tpu.matmul %1, %2, %cst {dimension_numbers = #tpu.dot_dimension_numbers<[1], [0], [0], [1], [0, 0, 1, 1], [], []>} : vector<2x32xbf16>, vector<32x128xbf16>, vector<2x128xf32> -> vector<2x128xf32>
    %c0_3 = arith.constant 0 : index
    %c0_4 = arith.constant 0 : index
    %4 = vector.load %arg2[%c0_3, %c0_4] : memref<1x128xf32, #tpu.memory_space<vmem>>, vector<1x128xf32>
    %5 = vector.broadcast %4 : vector<1x128xf32> to vector<2x128xf32>
    %6 = arith.addf %3, %5 : vector<2x128xf32>
    %7 = arith.negf %6 : vector<2x128xf32>
    %8 = math.exp %7 : vector<2x128xf32>
    %cst_5 = arith.constant 1.000000e+00 : f32
    %9 = vector.broadcast %cst_5 : f32 to vector<2x128xf32>
    %10 = arith.addf %9, %8 : vector<2x128xf32>
    %11 = arith.divf %9, %10 : vector<2x128xf32>
    %12 = arith.mulf %6, %11 : vector<2x128xf32>
    %13 = arith.truncf %12 : vector<2x128xf32> to vector<2x128xbf16>
    %c0_6 = arith.constant 0 : index
    %c0_7 = arith.constant 0 : index
    %14 = vector.load %arg3[%c0_6, %c0_7] : memref<128x32xbf16, #tpu.memory_space<vmem>>, vector<128x32xbf16>
    %cst_8 = arith.constant dense<0.000000e+00> : vector<2x32xf32>
    %15 = tpu.matmul %13, %14, %cst_8 {dimension_numbers = #tpu.dot_dimension_numbers<[1], [0], [0], [1], [0, 0, 1, 1], [], []>} : vector<2x128xbf16>, vector<128x32xbf16>, vector<2x32xf32> -> vector<2x32xf32>
    %c0_9 = arith.constant 0 : index
    %c0_10 = arith.constant 0 : index
    %16 = vector.load %arg4[%c0_9, %c0_10] : memref<1x32xf32, #tpu.memory_space<vmem>>, vector<1x32xf32>
    %17 = vector.broadcast %16 : vector<1x32xf32> to vector<2x32xf32>
    %18 = arith.addf %15, %17 : vector<2x32xf32>
    %c0_11 = arith.constant 0 : index
    %c0_12 = arith.constant 0 : index
    %19 = vector.load %arg5[%c0_11, %c0_12] : memref<2x32xf32, #tpu.memory_space<vmem>>, vector<2x32xf32>
    tpu.vector_store %arg5[%c0_11, %c0_12], %18 {strides = array<i32>} : memref<2x32xf32, #tpu.memory_space<vmem>>, vector<2x32xf32>,
    return
  }
}

</mosaic_0001>

<bundles_post_ra>
// kernel: tpu_custom_call.1
= control target key start
LH: loop header
LB: loop body
LE: loop exit
PB: predicated region body
PF: predicated region fallthrough
CT: control target
= control target key end

     0   :  { %v321_v1 = vmov 0.0   ;;  %vm322_vm0 = vmmov 0   ;;  %vm47_vm1 = vcmask 261120   ;;  %s405_s0 = inlined_call_operand.vmem [shape: f32[2,32], index: 0, kind: input, shape index: {}]   ;;  %s406_s1 = inlined_call_operand.vmem [shape: bf16[32,128], index: 1, kind: input, shape index: {}]   ;;  %s407_s2 = inlined_call_operand.vmem [shape: f32[1,128], index: 2, kind: input, shape index: {}]   ;;  %s408_s3 = inlined_call_operand.vmem [shape: bf16[128,32], index: 3, kind: input, shape index: {}]   ;;  %s409_s4 = inlined_call_operand.vmem [shape: f32[1,32], index: 4, kind: input, shape index: {}]   ;;  %s410_s5 = inlined_call_operand.hbm [shape: f32[2,32], index: 5, kind: output, shape index: {}]  }
   0x1   :  { %v283_v0 = vld [vmem:[%s406_s1] sm:$0xff]   ;;  %252 = vmatprep.subr.bf16.mxu0 %v321_v1  ;;  %260 = vmatprep.subr.bf16.mxu1 %v321_v1  ;;  %v284_v2 = vld [vmem:[%s406_s1 + $0x8] sm:$0xff]  }
   0x2   :  { %253 = vmatpush3.bf16.msra.mxu0 %v283_v0  ;;  %256 = vmatprep.mubr.msk.bf16.mxu0 %vm322_vm0, %v321_v1  ;;  %v22_v3 = vld [vmem:[%s405_s0] sm:$0x3] }
   0x3   :  { %254 = vmatprep.subr.bf16.mxu0 %v321_v1  ;;  %276 = vmatprep.mubr.msk.bf16.mxu1 %vm322_vm0, %v321_v1  ;;  %v23_v4 = vpack.c.bf16 %v22_v3, %v22_v3 }
   0x6   :  { %255 = vmatpush3.bf16.msra.mxu0 %v284_v2 }
   0x7   :  { %10 = vsyncpa [#allocation3], 0  ;;  %v285_v5 = vld [vmem:[%s408_s3] sm:$0xff]   ;;  %v286_v6 = vld [vmem:[%s408_s3 + $0x8] sm:$0xff]   ;;  %s323_s16 = smov [#allocation2]   ;;  %vm210_vm2 = vcmask 254976  }
   0x8   :  { %261 = vmatpush3.bf16.msra.mxu1 %v285_v5  ;;  %v287_v7 = vld [vmem:[%s408_s3 + $0x10] sm:$0xff]   ;;  %v288_v8 = vld [vmem:[%s408_s3 + $0x18] sm:$0xff]   ;;  %v289_v9 = vld [vmem:[%s408_s3 + $0x20] sm:$0xff]  }
   0x9   :  { %257 = vmatmul.mubr.msk.bf16.vlgmr.msra.gmra.mrb[0].mxu0 %vm47_vm1, %v23_v4  ;;  %262 = vmatprep.subr.bf16.mxu1 %v321_v1  ;;  %v290_v10 = vld [vmem:[%s408_s3 + $0x28] sm:$0xff]   ;;  %v291_v11 = vld [vmem:[%s408_s3 + $0x30] sm:$0xff]   ;;  %v292_v12 = vld [vmem:[%s408_s3 + $0x38] sm:$0xff]  }
   0xa   :  { %v226_v13 = vld [vmem:[%s407_s2] ss:$0 sm:$0xff]  ;;  %s218_s2 = sshll.u32 %s323_s16, 4  ;;  %s219_s2 = int_to_ptr.vmem [resolvable:$true] %s218_s2 }
   0xb   :  { %v231_v25 = vld [vmem:[%s409_s4] ss:$0 sm:$0xff]  ;;  %s297_s17 = scalar_lea.vmem %s219_s2, 32  ;;  %p302_p1 = scmp.lt.s32.totalorder %s219_s2, %s219_s2 }
   0xc   :  { %263 = vmatpush3.bf16.msra.mxu1 %v286_v6  ;;  %p298_p0 = scmp.ne.s32.totalorder %s219_s2, %s297_s17  ;;  %p303_p2 = scmp.lt.s32.totalorder %s297_s17, %s297_s17 }
   0xd   :  { %264 = vmatprep.subr.bf16.mxu1 %v321_v1 }
   0xe   :  { %p304_p3 = por %p303_p2, %p302_p1 }
  0x10   :  { %265 = vmatpush3.bf16.msra.mxu1 %v287_v7  ;;  %p305_p4 = pnand %p304_p3, %p298_p0 }
  0x11   :  { %266 = vmatprep.subr.bf16.mxu1 %v321_v1 }
  0x14   :  { %267 = vmatpush3.bf16.msra.mxu1 %v288_v8 }
  0x15   :  { %268 = vmatprep.subr.bf16.mxu1 %v321_v1 }
  0x18   :  { %269 = vmatpush3.bf16.msra.mxu1 %v289_v9 }
  0x19   :  { %270 = vmatprep.subr.bf16.mxu1 %v321_v1 }
  0x1c   :  { %271 = vmatpush3.bf16.msra.mxu1 %v290_v10 }
  0x1d   :  { %272 = vmatprep.subr.bf16.mxu1 %v321_v1 }
  0x20   :  { %273 = vmatpush3.bf16.msra.mxu1 %v291_v11 }
  0x21   :  { %274 = vmatprep.subr.bf16.mxu1 %v321_v1 }
  0x24   :  { %275 = vmatpush3.bf16.msra.mxu1 %v292_v12 }
  0xdc   :  { %v85_v14 = vpop.f32.mrb[0].mxu0 }
  0xdd   :  { %v86_v15 = vadd.f32 %v226_v13, %v85_v14  ;;  %v258_v16 = vpop.f32.mrb[1].mxu0 }
  0xde   :  { %v88_v17 = vpop.f32.mrb[2].mxu0 }
  0xdf   :  { %v230_v18 = vmul.f32 -1.442695, %v86_v15  ;;  %v259_v19 = vpop.f32.mrb[3].mxu0 }
  0xe1   :  { %293 = vpow2.f32 %v230_v18 }
  0xeb   :  { %v294_v20 = vpop.eup %293 }
  0xec   :  { %v94_v21 = vadd.f32 1.0, %v294_v20 }
  0xee   :  { %295 = vrcp.f32 %v94_v21 }
  0xf8   :  { %v296_v22 = vpop.eup %295 }
  0xf9   :  { %v97_v23 = vmul.f32 %v296_v22, %v86_v15 }
  0xfb   :  { %v98_v24 = vpack.c.bf16 %v97_v23, %v97_v23 }
  0xfd   :  { %277 = vmatmul.mubr.bf16.vlgmr.msra.gmra.mrb[0].mxu1 %v98_v24 }
 0x1d0   :  { %v204_v26 = vpop.f32.mrb[0].mxu1 }
 0x1d1   :  { %v205_v27 = vadd.f32 %v231_v25, %v204_v26  ;;  %v278_v28 = vpop.f32.mrb[1].mxu1 }
 0x1d2   :  { %v207_v29 = vpop.f32.mrb[2].mxu1 }
 0x1d3   :  { %v279_v30 = vpop.f32.mrb[3].mxu1  ;;  %211 = vst.msk [vmem:[#allocation2] sm:$0x3] %vm210_vm2, %v205_v27 }
 0x1d4   :  { %308 = shalt.err (!%p305_p4)
}
 0x1d5   :  { %s309_s4 = scalar_lea.hbm %s410_s5, 32 }
 0x1d6   :  { %p310_p5 = scmp.ne.s32.totalorder %s410_s5, %s309_s4  ;;  %p313_p6 = scmp.lt.u32.totalorder %s309_s4, %s410_s5 }
 0x1d8   :  { %p315_p7 = pnand %p313_p6, %p310_p5 }
 0x1da   :  { %318 = shalt.err (!%p315_p7)
}
 0x1db   :  { %221 = dma.vmem_to_hbm [thread:$0]  %s219_s2, 32, %s410_s5, [#allocation3]  }
 0x1dc   :  { %319 = dma.done.wait [#allocation3], 32  }
 0x1dd   :  { %320 = vsyncadd [#allocation3], 4294967264 }
 0x1de   :  { %225 = vsyncpa [#allocation3], 1 }

</bundles_post_ra>
